<compile_context>
chip_gen: v7x
topology: tpu7x:2x2x1
jax: 0.10.0
libtpu: 0.0.40
codegen_flags: <defaults>
</compile_context>

<pallas_src>
import functools

import jax
import jax.numpy as jnp
from jax import lax
from jax.experimental import pallas as pl
from jax.experimental.pallas import tpu as pltpu

INV_SQRT2 = 0.7071067811865476
SQRT_2_OVER_PI = 0.7978845608028654
LN_EPS = 1e-5


def _conv_block_kernel(p_ref, w_ref, a_ref, o_ref, *, approximate_gelu):
    """One (batch, L-tile) grid step.

    p_ref : [1, CK, TL]     im2col patches, lane-dense along L (stream dtype)
    w_ref : [C_out, CK]     reshaped conv weight (stream dtype), VMEM-resident
    a_ref : [C_out, 3]      packed (conv bias, ln gamma, ln beta), f32, VMEM-resident
    o_ref : [1, C_out, TL]  output tile already in NCL layout (lane-dense along L)
    """
    # Cast to f32 before the dot: avoids the unsupported bf16 x bf16 = f32 dot on
    # the interpret/CPU path; matmul cost is negligible at CK=12 / C_out=32.
    p = p_ref[0].astype(jnp.float32)                         # [CK, TL]
    w = w_ref[...].astype(jnp.float32)                       # [C_out, CK]
    y = jnp.dot(w, p, preferred_element_type=jnp.float32)    # [C_out, TL] (NCL layout)

    aff = a_ref[...]                                         # [C_out, 3] f32
    y = y + aff[:, 0:1]                                      # conv bias

    # LayerNorm over the channel axis (axis 0), single-pass variance, f32 stats.
    mean = jnp.mean(y, axis=0, keepdims=True)                # [1, TL]
    mean_sq = jnp.mean(y * y, axis=0, keepdims=True)         # [1, TL]
    var = mean_sq - mean * mean
    yn = (y - mean) * lax.rsqrt(var + LN_EPS)
    yn = yn * aff[:, 1:2] + aff[:, 2:3]

    if approximate_gelu:
        # tanh-approx GELU (EUP-native) — optional; deviates slightly from PyTorch.
        inner = SQRT_2_OVER_PI * (yn + 0.044715 * yn * yn * yn)
        act = 0.5 * yn * (1.0 + jnp.tanh(inner))
    else:
        # Exact (erf) GELU — matches PyTorch's default approximate='none'.
        act = 0.5 * yn * (1.0 + lax.erf(yn * INV_SQRT2))

    o_ref[0] = act.astype(o_ref.dtype)                       # direct NCL store


def _round_up(v, m):
    return (v + m - 1) // m * m


def _pick_row_tile(l_out, ck, c_out, in_bytes, out_bytes,
                   budget_bytes=12 * 1024 * 1024):
    """Largest L tile (multiple of 128, <= 8192) whose double-buffered input and
    output blocks fit a conservative VMEM budget (leaves headroom for the f32
    in-kernel intermediates even on v7x's 64 MiB VMEM).  Accounts for sublane
    padding of the CK / C_out axes (bf16 -> mult of 16, f32 -> mult of 8)."""
    ck_pad = _round_up(ck, max(1, 32 // in_bytes))
    cout_pad = _round_up(c_out, max(1, 32 // out_bytes))
    per_col = 2 * (ck_pad * in_bytes + cout_pad * out_bytes)   # double-buffered in+out
    tl = budget_bytes // max(per_col, 1)
    tl = int(min(8192, (tl // 128) * 128))
    tl = max(tl, 128)
    return l_out if l_out <= tl else tl


def conv_layer_block(x, weight, bias, gamma, beta, *, stride, padding,
                     stream_dtype=jnp.bfloat16, out_dtype=None,
                     approximate_gelu=False):
    """x: [B, C_in, L_in]; weight: [C_out, C_in, K]; bias/gamma/beta: [C_out].

    Returns [B, C_out, L_out] — same layout as the PyTorch module.
    Set stream_dtype=jnp.float32 for bit-closer conv parity; out_dtype=jnp.bfloat16
    to halve the output HBM stream.
    """
    B, C_in, L_in = x.shape
    C_out, _, K = weight.shape
    L_out = (L_in + 2 * padding - K) // stride + 1
    CK = C_in * K
    out_dtype = x.dtype if out_dtype is None else out_dtype

    # im2col in [B, C_in*K, L_out] with channel-major (c*K + k) feature ordering
    # (matches weight.reshape(C_out, C_in*K)); built from K strided slices so L stays
    # the minor (lane) axis and the kernel's DMA rows are lane-dense.
    # TODO(synk): replace with an in-kernel halo-DMA conv (x left in HBM) to avoid
    # materializing the K-amplified patch stream in HBM.
    x_pad = jnp.pad(x, ((0, 0), (0, 0), (padding, padding))) if padding else x
    cols = [lax.slice_in_dim(x_pad, k, k + stride * (L_out - 1) + 1,
                             stride=stride, axis=2) for k in range(K)]
    patches = jnp.stack(cols, axis=2).reshape(B, CK, L_out).astype(stream_dtype)

    w2d = weight.reshape(C_out, CK).astype(stream_dtype)      # [C_out, CK]
    affine = jnp.stack(
        [bias.astype(jnp.float32),
         gamma.astype(jnp.float32),
         beta.astype(jnp.float32)], axis=1)                    # [C_out, 3]

    TL = _pick_row_tile(L_out, CK, C_out,
                        in_bytes=jnp.dtype(stream_dtype).itemsize,
                        out_bytes=jnp.dtype(out_dtype).itemsize)
    # v7x has 2 TensorCores/chip: keep at least 2 "parallel" grid steps when possible.
    if B * pl.cdiv(L_out, TL) < 2 and L_out > 128:
        TL = max(128, _round_up((L_out + 1) // 2, 128))
    num_lt = pl.cdiv(L_out, TL)

    kernel = functools.partial(_conv_block_kernel, approximate_gelu=approximate_gelu)
    return pl.pallas_call(
        kernel,
        out_shape=jax.ShapeDtypeStruct((B, C_out, L_out), out_dtype),
        grid=(B, num_lt),
        in_specs=[
            pl.BlockSpec((1, CK, TL), lambda b, l: (b, 0, l)),
            pl.BlockSpec((C_out, CK), lambda b, l: (0, 0)),    # weight stays resident
            pl.BlockSpec((C_out, 3), lambda b, l: (0, 0)),     # packed affine, resident
        ],
        out_specs=pl.BlockSpec((1, C_out, TL), lambda b, l: (b, 0, l)),
        compiler_params=pltpu.CompilerParams(
            dimension_semantics=("parallel", "parallel"),
            vmem_limit_bytes=48 * 1024 * 1024,
        ),
    )(patches, w2d, affine)


if __name__ == "__main__":
    # Module config (small, consistent with ConvLayerBlock ctor)
    in_channels, out_channels = 4, 32
    kernel_size, stride, padding, use_bias = 3, 2, 1, True
    B, L_in = 2, 16

    key = jax.random.PRNGKey(0)
    kx, kw, kb, kg, kbeta = jax.random.split(key, 5)

    x = jax.random.normal(kx, (B, in_channels, L_in), dtype=jnp.float32)
    weight = jax.random.normal(
        kw, (out_channels, in_channels, kernel_size), dtype=jnp.float32) * 0.1
    bias = (jax.random.normal(kb, (out_channels,), dtype=jnp.float32) * 0.1
            if use_bias else jnp.zeros((out_channels,), jnp.float32))
    gamma = jnp.ones((out_channels,), jnp.float32) + \
        0.05 * jax.random.normal(kg, (out_channels,), dtype=jnp.float32)
    beta = 0.05 * jax.random.normal(kbeta, (out_channels,), dtype=jnp.float32)

    fn = jax.jit(functools.partial(conv_layer_block, stride=stride, padding=padding))
    out = fn(x, weight, bias, gamma, beta)
    jax.block_until_ready(out)

    expected_L_out = (L_in + 2 * padding - kernel_size) // stride + 1
    assert out.shape == (B, out_channels, expected_L_out), out.shape
    assert bool(jnp.all(jnp.isfinite(out)))

    # Plain-JAX f32 reference of the same forward pass (tolerance covers the
    # bf16-streamed conv operands; LN/GELU are f32 in both).
    def ref_forward(xx, w, b, g, bt):
        y = lax.conv_general_dilated(
            xx, w, window_strides=(stride,), padding=[(padding, padding)],
            dimension_numbers=("NCH", "OIH", "NCH"),
            precision=lax.Precision.HIGHEST)
        y = y + b[None, :, None]
        y = jnp.transpose(y, (0, 2, 1))
        mu = jnp.mean(y, axis=-1, keepdims=True)
        var = jnp.mean((y - mu) ** 2, axis=-1, keepdims=True)
        y = (y - mu) * lax.rsqrt(var + LN_EPS) * g + bt
        y = jnp.transpose(y, (0, 2, 1))
        return 0.5 * y * (1.0 + lax.erf(y * INV_SQRT2))

    ref = ref_forward(x, weight, bias, gamma, beta)
    assert jnp.allclose(out, ref, atol=3e-2, rtol=3e-2), \
        float(jnp.max(jnp.abs(out - ref)))
    print("KERNEL_OK")
</pallas_src>

<mosaic_0001>
module attributes {stable_mosaic.version = 11 : i64} {
  func.func @_conv_block_kernel(%arg0: i32, %arg1: i32, %arg2: memref<1x12x8xbf16, #tpu.memory_space<vmem>>, %arg3: memref<32x12xbf16, #tpu.memory_space<vmem>>, %arg4: memref<32x3xf32, #tpu.memory_space<vmem>>, %arg5: memref<1x32x8xf32, #tpu.memory_space<vmem>>) attributes {dimension_semantics = [#tpu.dimension_semantics<parallel>, #tpu.dimension_semantics<parallel>], iteration_bounds = array<i64: 2, 1>, scalar_prefetch = 0 : i64, scratch_operands = 0 : i64, tpu.core_type = #tpu.core_type<tc>, window_params = [{transform_indices = @transform_0, window_bounds = array<i64: 1, 12, 8>}, {pipeline_mode = #tpu.pipeline_mode<synchronous>, transform_indices = @transform_1, window_bounds = array<i64: 32, 12>}, {pipeline_mode = #tpu.pipeline_mode<synchronous>, transform_indices = @transform_2, window_bounds = array<i64: 32, 3>}, {transform_indices = @transform_3, window_bounds = array<i64: 1, 32, 8>}]} {
    %c0 = arith.constant 0 : index
    %c0_0 = arith.constant 0 : index
    %c0_1 = arith.constant 0 : index
    %0 = vector.load %arg2[%c0, %c0_0, %c0_1] : memref<1x12x8xbf16, #tpu.memory_space<vmem>>, vector<1x12x8xbf16>
    %1 = vector.shape_cast %0 : vector<1x12x8xbf16> to vector<12x8xbf16>
    %2 = arith.extf %1 : vector<12x8xbf16> to vector<12x8xf32>
    %c0_2 = arith.constant 0 : index
    %c0_3 = arith.constant 0 : index
    %3 = vector.load %arg3[%c0_2, %c0_3] : memref<32x12xbf16, #tpu.memory_space<vmem>>, vector<32x12xbf16>
    %4 = arith.extf %3 : vector<32x12xbf16> to vector<32x12xf32>
    %cst = arith.constant dense<0.000000e+00> : vector<32x8xf32>
    %5 = tpu.matmul %4, %2, %cst {dimension_numbers = #tpu.dot_dimension_numbers<[1], [0], [0], [1], [0, 0, 1, 1], [], []>} : vector<32x12xf32>, vector<12x8xf32>, vector<32x8xf32> -> vector<32x8xf32>
    %c0_4 = arith.constant 0 : index
    %c0_5 = arith.constant 0 : index
    %6 = vector.load %arg4[%c0_4, %c0_5] : memref<32x3xf32, #tpu.memory_space<vmem>>, vector<32x3xf32>
    %7 = vector.extract_strided_slice %6 {offsets = [0, 0], sizes = [32, 1], strides = [1, 1]} : vector<32x3xf32> to vector<32x1xf32>
    %8 = vector.broadcast %7 : vector<32x1xf32> to vector<32x8xf32>
    %9 = arith.addf %5, %8 : vector<32x8xf32>
    %cst_6 = arith.constant dense<0.000000e+00> : vector<8xf32>
    %10 = vector.multi_reduction <add>, %9, %cst_6 [0] : vector<32x8xf32> to vector<8xf32>
    %11 = vector.shape_cast %10 : vector<8xf32> to vector<1x8xf32>
    %cst_7 = arith.constant 3.200000e+01 : f32
    %12 = vector.broadcast %cst_7 : f32 to vector<1x8xf32>
    %13 = arith.divf %11, %12 : vector<1x8xf32>
    %14 = arith.mulf %9, %9 : vector<32x8xf32>
    %cst_8 = arith.constant dense<0.000000e+00> : vector<8xf32>
    %15 = vector.multi_reduction <add>, %14, %cst_8 [0] : vector<32x8xf32> to vector<8xf32>
    %16 = vector.shape_cast %15 : vector<8xf32> to vector<1x8xf32>
    %cst_9 = arith.constant 3.200000e+01 : f32
    %17 = vector.broadcast %cst_9 : f32 to vector<1x8xf32>
    %18 = arith.divf %16, %17 : vector<1x8xf32>
    %19 = arith.mulf %13, %13 : vector<1x8xf32>
    %20 = arith.subf %18, %19 : vector<1x8xf32>
    %21 = vector.broadcast %13 : vector<1x8xf32> to vector<32x8xf32>
    %22 = arith.subf %9, %21 : vector<32x8xf32>
    %cst_10 = arith.constant 9.99999974E-6 : f32
    %23 = vector.broadcast %cst_10 : f32 to vector<1x8xf32>
    %24 = arith.addf %20, %23 : vector<1x8xf32>
    %25 = math.rsqrt %24 : vector<1x8xf32>
    %26 = vector.broadcast %25 : vector<1x8xf32> to vector<32x8xf32>
    %27 = arith.mulf %22, %26 : vector<32x8xf32>
    %28 = vector.extract_strided_slice %6 {offsets = [0, 1], sizes = [32, 1], strides = [1, 1]} : vector<32x3xf32> to vector<32x1xf32>
    %29 = vector.broadcast %28 : vector<32x1xf32> to vector<32x8xf32>
    %30 = arith.mulf %27, %29 : vector<32x8xf32>
    %31 = vector.extract_strided_slice %6 {offsets = [0, 2], sizes = [32, 1], strides = [1, 1]} : vector<32x3xf32> to vector<32x1xf32>
    %32 = vector.broadcast %31 : vector<32x1xf32> to vector<32x8xf32>
    %33 = arith.addf %30, %32 : vector<32x8xf32>
    %cst_11 = arith.constant 5.000000e-01 : f32
    %34 = vector.broadcast %cst_11 : f32 to vector<32x8xf32>
    %35 = arith.mulf %34, %33 : vector<32x8xf32>
    %cst_12 = arith.constant 0.707106769 : f32
    %36 = vector.broadcast %cst_12 : f32 to vector<32x8xf32>
    %37 = arith.mulf %33, %36 : vector<32x8xf32>
    %38 = math.erf %37 : vector<32x8xf32>
    %cst_13 = arith.constant 1.000000e+00 : f32
    %39 = vector.broadcast %cst_13 : f32 to vector<32x8xf32>
    %40 = arith.addf %39, %38 : vector<32x8xf32>
    %41 = arith.mulf %35, %40 : vector<32x8xf32>
    %c0_14 = arith.constant 0 : index
    %c0_15 = arith.constant 0 : index
    %c0_16 = arith.constant 0 : index
    %42 = vector.load %arg5[%c0_14, %c0_15, %c0_16] : memref<1x32x8xf32, #tpu.memory_space<vmem>>, vector<1x32x8xf32>
    %43 = vector.shape_cast %42 : vector<1x32x8xf32> to vector<32x8xf32>
    %44 = vector.shape_cast %41 : vector<32x8xf32> to vector<1x32x8xf32>
    tpu.vector_store %arg5[%c0_14, %c0_15, %c0_16], %44 {strides = array<i32>} : memref<1x32x8xf32, #tpu.memory_space<vmem>>, vector<1x32x8xf32>,
    return
  }
  func.func @transform_0(%arg0: i32, %arg1: i32) -> (i32, i32, i32) {
    %c0_i32 = arith.constant 0 : i32
    %c0_i32_0 = arith.constant 0 : i32
    return %arg0, %c0_i32, %arg1 : i32, i32, i32
  }
  func.func @transform_1(%arg0: i32, %arg1: i32) -> (i32, i32) {
    %c0_i32 = arith.constant 0 : i32
    %c0_i32_0 = arith.constant 0 : i32
    %c0_i32_1 = arith.constant 0 : i32
    return %c0_i32, %c0_i32_0 : i32, i32
  }
  func.func @transform_2(%arg0: i32, %arg1: i32) -> (i32, i32) {
    %c0_i32 = arith.constant 0 : i32
    %c0_i32_0 = arith.constant 0 : i32
    %c0_i32_1 = arith.constant 0 : i32
    return %c0_i32, %c0_i32_0 : i32, i32
  }
  func.func @transform_3(%arg0: i32, %arg1: i32) -> (i32, i32, i32) {
    %c0_i32 = arith.constant 0 : i32
    %c0_i32_0 = arith.constant 0 : i32
    return %arg0, %c0_i32, %arg1 : i32, i32, i32
  }
}

</mosaic_0001>

<bundles_post_ra>
// kernel: conv_layer_block.1
= control target key start
LH: loop header
LB: loop body
LE: loop exit
PB: predicated region body
PF: predicated region fallthrough
CT: control target
= control target key end

     0   :  { %s679_s12 = smov 0   ;;  %s681_s13 = smov 0   ;;  %s750_s0 = inlined_call_operand.vmem [shape: bf16[2,12,8], index: 0, kind: input, shape index: {}]   ;;  %s751_s1 = inlined_call_operand.vmem [shape: bf16[32,12], index: 1, kind: input, shape index: {}]   ;;  %s752_s2 = inlined_call_operand.vmem [shape: f32[32,3], index: 2, kind: input, shape index: {}]   ;;  %s753_s3 = inlined_call_operand.vmem [shape: f32[2,32,8], index: 3, kind: output, shape index: {}]  }
   0x1   :  { %s683_s14 = smov 0  }
   0x2 LB: > { %s25_s15 = sadd.s32 1, %s649_s13  ;;  %p537_p0 = scmp.ge.s32.totalorder %s653_s14, 1  ;;  %s653_s14 = sphi %s683_s14, %s13_s14   ;;  %s649_s13 = sphi %s681_s13, %s755_s13   ;;  %s645_s12 = sphi %s679_s12, %s754_s12  }
   0x3   : > { %p27_p1 = scmp.ge.s32.totalorder %s25_s15, 2  ;;  %p156_p2 = scmp.lt.s32.totalorder %s653_s14, 3 }
   0x5   : > { %s757_s15 = smov (%p27_p1, %s25_s15), 0  ;;  %p157_p3 = pnand %p537_p0, %p156_p2 }
   0x6   : > { %p186_p4 = scmp.lt.s32.totalorder (!%p157_p3), %s645_s12, 1  ;;  %v552_v0 = vld [vmem:[%s751_s1] sm:$0xff] (!%p157_p3)   ;;  %vm238_vm0 = vcmask (!%p157_p3), 97280   ;;  %v559_v1 = vld [vmem:[%s751_s1 + $0x8] sm:$0xff] (!%p157_p3)   ;;  %vm251_vm1 = vcmask (!%p157_p3), 1043456   ;;  %v216_v5 = vld [vmem:[%s752_s2 + $0x10] sm:$0xff] (!%p157_p3) }
   0x7   : > { %160 = sbr.rel (%p157_p3) target bundleno = 302 (0x12e), region = 32  ;;  %v553_v2 = vunpack.c.l.bf16 (!%p157_p3), %v552_v0  ;;  %v557_v3 = vunpack.c.l.bf16 (!%p157_p3), %v559_v1  ;;  %v214_v4 = vld [vmem:[%s752_s2] sm:$0xff] (!%p157_p3)  ;;  %v655_v6 = vmov (!%p157_p3), 0   ;;  %vm656_vm2 = vmmov (!%p157_p3), 1   ;;  %v215_v8 = vld [vmem:[%s752_s2 + $0x8] sm:$0xff] (!%p157_p3)  ;;  %v217_v9 = vld [vmem:[%s752_s2 + $0x18] sm:$0xff] (!%p157_p3) }
   0x8   : > { %614 = vset.pattern.permute.xlu0 (!%p157_p3), %v655_v6  ;;  %615 = vset.pattern.permute.xlu1 (!%p157_p3), %v655_v6  ;;  %vm577_vm3 = vmpackc.low (!%p157_p3), %vm251_vm1, %vm656_vm2  ;;  %v554_v10 = vunpack.c.h.bf16 (!%p157_p3), %v552_v0  ;;  %v558_v11 = vunpack.c.h.bf16 (!%p157_p3), %v559_v1  ;;  %v657_v12 = vmov (!%p157_p3), 1   ;;  %v658_v13 = vmov (!%p157_p3), 2  }
   0x9   : > { %570 = vmatprep.mubr.msk.f32.mxu0 (!%p157_p3), %vm238_vm0, %v553_v2  ;;  %573 = vmatprep.mubr.msk.f32.mxu1 (!%p157_p3), %vm238_vm0, %v557_v3  ;;  %vm340_vm4 = vcmask (!%p157_p3), 64512  }
   0xa   : > { %220 = vperm.xlu0 (!%p157_p3), %614, %v214_v4   ;;  %230 = vperm.xlu1 (!%p157_p3), %615, %v216_v5  }
   0xe   : > { %s759_s12 = smov (!%p186_p4, %s645_s12), 1  ;;  %225 = vperm.xlu0 %614, %v215_v8   ;;  %235 = vperm.xlu1 %615, %v217_v9  }
   0xf   : > { %s549_s24 = sshll.u32 %s759_s12, 3  ;;  %s550_s5 = sshll.u32 %s759_s12, 5 }
  0x10   : > { %s193_s27 = scalar_lea.vmem %s750_s0, %s549_s24  ;;  %s201_s8 = scalar_lea.vmem %s753_s3, %s550_s5 }
  0x11   : > { %v620_v7 = vld [vmem:[%s193_s27] sm:$0x3f]  }
  0x12   : > { %578 = vmatprep.subr.msk.bf16.mxu0 %vm577_vm3, %v620_v7  ;;  %582 = vmatprep.subr.msk.bf16.mxu1 %vm577_vm3, %v620_v7 }
  0x13   : > { %581 = vmatpush3.bf16.msk.msra.mxu0 %vm577_vm3, %v620_v7  ;;  %583 = vmatpush3.bf16.msk.msra.mxu1 %vm577_vm3, %v620_v7 }
  0x14   : > { %617 = vset.pattern.permute.xlu1 %v657_v12  ;;  %616 = vset.pattern.permute.xlu0 %v657_v12 }
  0x15   : > { %391 = vperm.xlu1 %617, %v215_v8   ;;  %387 = vperm.xlu0 %616, %v214_v4  }
  0x16   : > { %571 = vmatmul.mubr.msk.f32.vlgmr.msra.gmra.mrb[0].mxu0 %vm238_vm0, %v554_v10  ;;  %574 = vmatmul.mubr.msk.f32.vlgmr.msra.gmra.mrb[0].mxu1 %vm238_vm0, %v558_v11 }
  0x19   : > { %395 = vperm.xlu1 %617, %v216_v5   ;;  %399 = vperm.xlu0 %616, %v217_v9  }
  0x1d   : > { %618 = vset.pattern.permute.xlu1 %v658_v13  ;;  %619 = vset.pattern.permute.xlu0 %v658_v13 }
  0x1e   : > { %407 = vperm.xlu1 %618, %v214_v4   ;;  %411 = vperm.xlu0 %619, %v215_v8  }
  0x22   : > { %415 = vperm.xlu1 %618, %v216_v5  }
  0x26   : > { %419 = vperm.xlu1 %618, %v217_v9  }
  0x89   : > { %v221_v14 = vpop.permute.xlu0 %220  ;;  %v231_v15 = vpop.permute.xlu1 %230 }
  0x8d   : > { %v226_v16 = vpop.permute.xlu0 %225  ;;  %v236_v17 = vpop.permute.xlu1 %235 }
  0x94   : > { %v392_v55 = vpop.permute.xlu1 %391  ;;  %v388_v4 = vpop.permute.xlu0 %387 }
  0x98   : > { %v396_v1 = vpop.permute.xlu1 %395  ;;  %v400_v6 = vpop.permute.xlu0 %399 }
  0x9d   : > { %v408_v3 = vpop.permute.xlu1 %407  ;;  %v412_v12 = vpop.permute.xlu0 %411 }
  0xa1   : > { %v416_v5 = vpop.permute.xlu1 %415 }
  0xe9   : > { %v572_v18 = vpop.f32.mrb[0].mxu0  ;;  %v575_v19 = vpop.f32.mrb[0].mxu1 }
  0xea   : > { %v327_v20 = vadd.f32 %v572_v18, %v226_v16  ;;  %v321_v21 = vpop.f32.mrb[1].mxu0  ;;  %v331_v22 = vpop.f32.mrb[1].mxu1  ;;  %v337_v23 = vadd.f32 %v575_v19, %v236_v17 }
  0xeb   : > { %v322_v24 = vadd.f32 %v321_v21, %v221_v14  ;;  %v332_v25 = vadd.f32 %v331_v22, %v231_v15  ;;  %v420_v17 = vpop.permute.xlu1 %419 }
  0xec   : > { %v342_v26 = vsel %vm340_vm4, %v327_v20, 0.0  ;;  %v357_v27 = vmul.f32 %v327_v20, %v327_v20  ;;  %v359_v33 = vmul.f32 %v337_v23, %v337_v23  ;;  %v346_v38 = vsel %vm340_vm4, %v337_v23, 0.0 }
  0xed   : > { %v341_v28 = vsel %vm340_vm4, %v322_v24, 0.0  ;;  %v356_v29 = vmul.f32 %v322_v24, %v322_v24  ;;  %v358_v30 = vmul.f32 %v332_v25, %v332_v25  ;;  %v344_v35 = vsel %vm340_vm4, %v332_v25, 0.0 }
  0xee   : > { %v361_v31 = vsel %vm340_vm4, %v357_v27, 0.0  ;;  %v343_v32 = vadd.f32 %v342_v26, %v341_v28  ;;  %v365_v42 = vsel %vm340_vm4, %v359_v33, 0.0 }
  0xef   : > { %v360_v34 = vsel %vm340_vm4, %v356_v29, 0.0  ;;  %v363_v39 = vsel %vm340_vm4, %v358_v30, 0.0 }
  0xf0   : > { %v362_v36 = vadd.f32 %v361_v31, %v360_v34  ;;  %v345_v37 = vadd.f32 %v344_v35, %v343_v32 }
  0xf2   : > { %v347_v40 = vadd.f32 %v346_v38, %v345_v37  ;;  %v364_v41 = vadd.f32 %v363_v39, %v362_v36 }
  0xf4   : > { %v348_v43 = vrot.slane %v347_v40, 4  ;;  %v366_v44 = vadd.f32 %v365_v42, %v364_v41 }
  0xf6   : > { %v349_v45 = vadd.f32 %v348_v43, %v347_v40  ;;  %v367_v46 = vrot.slane %v366_v44, 4 }
  0xf8   : > { %v350_v47 = vrot.slane %v349_v45, 2  ;;  %v368_v48 = vadd.f32 %v367_v46, %v366_v44 }
  0xfa   : > { %v351_v49 = vadd.f32 %v350_v47, %v349_v45  ;;  %v369_v50 = vrot.slane %v368_v48, 2 }
  0xfc   : > { %v352_v51 = vrot.slane %v351_v49, 1  ;;  %v370_v52 = vadd.f32 %v369_v50, %v368_v48 }
  0xfe   : > { %v353_v53 = vadd.f32 %v352_v51, %v351_v49  ;;  %v371_v54 = vrot.slane %v370_v52, 1 }
 0x100   : > { %v355_v56 = vmul.f32 0.03125, %v353_v53  ;;  %v372_v57 = vadd.f32 %v371_v54, %v370_v52 }
 0x102   : > { %v373_v58 = vmul.f32 0.03125, %v372_v57  ;;  %v374_v59 = vmul.f32 %v355_v56, %v355_v56  ;;  %v377_v60 = vsub.f32 %v327_v20, %v355_v56  ;;  %v378_v61 = vsub.f32 %v332_v25, %v355_v56 }
 0x103   : > { %v376_v62 = vsub.f32 %v322_v24, %v355_v56  ;;  %v379_v63 = vsub.f32 %v337_v23, %v355_v56 }
 0x104   : > { %v375_v0 = vsub.f32 %v373_v58, %v374_v59 }
 0x106   : > { %v380_v2 = vadd.f32 1e-05, %v375_v0 }
 0x108   : > { %621 = vrsqrt.f32 %v380_v2 }
 0x112   : > { %v622_v7 = vpop.eup %621 }
 0x113   : > { %v383_v8 = vmul.f32 %v622_v7, %v377_v60  ;;  %v384_v9 = vmul.f32 %v622_v7, %v378_v61  ;;  %v382_v10 = vmul.f32 %v622_v7, %v376_v62  ;;  %v385_v11 = vmul.f32 %v622_v7, %v379_v63 }
 0x115   : > { %v403_v13 = vmul.f32 %v392_v55, %v383_v8  ;;  %v404_v14 = vmul.f32 %v396_v1, %v384_v9  ;;  %v402_v15 = vmul.f32 %v388_v4, %v382_v10  ;;  %v405_v16 = vmul.f32 %v400_v6, %v385_v11 }
 0x117   : > { %v422_v18 = vadd.f32 %v408_v3, %v402_v15  ;;  %v424_v19 = vadd.f32 %v416_v5, %v404_v14  ;;  %v425_v20 = vadd.f32 %v420_v17, %v405_v16  ;;  %v423_v21 = vadd.f32 %v412_v12, %v403_v13 }
 0x119   : > { %v430_v22 = vmul.f32 0.70710677, %v422_v18  ;;  %v432_v23 = vmul.f32 0.70710677, %v424_v19  ;;  %v433_v24 = vmul.f32 0.70710677, %v425_v20 }
 0x11a   : > { %v431_v25 = vmul.f32 0.70710677, %v423_v21  ;;  %v426_v28 = vmul.f32 0.5, %v422_v18  ;;  %v428_v31 = vmul.f32 0.5, %v424_v19  ;;  %v429_v35 = vmul.f32 0.5, %v425_v20 }
 0x11b   : > { %623 = verf.f32 %v430_v22  ;;  %v427_v38 = vmul.f32 0.5, %v423_v21 }
 0x11c   : > { %625 = verf.f32 %v432_v23 }
 0x11d   : > { %627 = verf.f32 %v433_v24 }
 0x11e   : > { %629 = verf.f32 %v431_v25 }
 0x125   : > { %v624_v26 = vpop.eup %623 }
 0x126   : > { %v626_v27 = vpop.eup %625  ;;  %v438_v29 = vadd.f32 1.0, %v624_v26 }
 0x127   : > { %v628_v30 = vpop.eup %627  ;;  %v440_v32 = vadd.f32 1.0, %v626_v27 }
 0x128   : > { %v630_v33 = vpop.eup %629  ;;  %v442_v34 = vmul.f32 %v438_v29, %v426_v28  ;;  %v441_v36 = vadd.f32 1.0, %v628_v30 }
 0x129   : > { %v444_v37 = vmul.f32 %v440_v32, %v428_v31  ;;  %v439_v39 = vadd.f32 1.0, %v630_v33 }
 0x12a   : > { %446 = vst.msk [vmem:[%s201_s8] sm:$0xff] %vm340_vm4, %v442_v34  ;;  %v445_v40 = vmul.f32 %v441_v36, %v429_v35 }
 0x12b   : > { %448 = vst.msk [vmem:[%s201_s8 + $0x10] sm:$0xff] %vm340_vm4, %v444_v37  ;;  %v443_v41 = vmul.f32 %v439_v39, %v427_v38 }
 0x12c   : > { %449 = vst.msk [vmem:[%s201_s8 + $0x18] sm:$0xff] %vm340_vm4, %v445_v40 }
 0x12d   : > { %447 = vst.msk [vmem:[%s201_s8 + $0x8] sm:$0xff] %vm340_vm4, %v443_v41 }
 0x12e PF: > { %s13_s14 = sadd.s32 1, %s653_s14   ;;  %s754_s12 = smov %s649_s13 }
 0x12f   : > { %p10_p5 = scmp.ge.s32.totalorder %s13_s14, 4   ;;  %s755_s13 = smov %s757_s15 }
 0x131   :  { %12 = sbr.rel (!%p10_p5) target bundleno = 2 (0x2), region = 62 }

</bundles_post_ra>
